<compile_context>
chip_gen: v7x
topology: tpu7x:2x2x1
jax: 0.10.0
libtpu: 0.0.40
codegen_flags: <defaults>
</compile_context>

<pallas_src>
import functools

import jax
import jax.numpy as jnp
from jax import lax
from jax.experimental import pallas as pl
from jax.experimental.pallas import tpu as pltpu

IGNORE_INDEX = -100
TARGET_BLOCK_BYTES = 4 * 1024 * 1024   # ~4 MiB of logits per grid step
MAX_CHUNKS_PER_TILE = 32               # bound on the unrolled in-kernel chunk loop


def _round_up(x, m):
    return ((x + m - 1) // m) * m


def _semantic_loss_kernel(logits_ref, gt_ref, ce_ref, inter_ref, psum_ref, *,
                          tile, chunk):
    """One (layer, batch, pixel-tile) grid step.

    logits_ref : (1, 1, C, TILE) f32/bf16  semantic logits (upcast per chunk)
    gt_ref     : (1, 1, TILE)    i32       class ids, -100 == ignore (padded in wrapper)
    ce_ref     : (1, 1, 1, TILE) f32       per-pixel CE (0 where ignored / padded)
    inter_ref  : (1, 1, C, 128)  f32       lane-dense dice intersection accumulator
    psum_ref   : (1, 1, C, 128)  f32       lane-dense dice prediction-sum accumulator
    """
    n = pl.program_id(2)
    C = logits_ref.shape[2]
    n_chunks = tile // chunk

    # hoisted: same for every chunk (JAX does not CSE broadcast/iota)
    cls_ids = lax.broadcasted_iota(jnp.int32, (C, chunk), 0)

    def lane_fold(x):                      # (C, chunk) -> (C, 128), aligned VPU adds
        acc = x[:, 0:128]
        for i in range(1, chunk // 128):
            acc = acc + x[:, i * 128:(i + 1) * 128]
        return acc

    inter_acc = jnp.zeros((C, 128), jnp.float32)
    psum_acc = jnp.zeros((C, 128), jnp.float32)

    for ci in range(n_chunks):
        lo = ci * chunk
        logits = logits_ref[0, 0, :, lo:lo + chunk].astype(jnp.float32)  # (C, chunk)
        gt = gt_ref[0, :, lo:lo + chunk]                                 # (1, chunk)

        valid = gt != IGNORE_INDEX                                       # (1, chunk)

        # numerically-stable softmax over the class (sublane) axis
        m = jnp.max(logits, axis=0, keepdims=True)                       # (1, chunk)
        z = logits - m
        ez = jnp.exp(z)
        denom = jnp.sum(ez, axis=0, keepdims=True)                       # (1, chunk)
        # approx reciprocal -> EUP slot; only dice probabilities use it (CE uses log)
        probs = ez * pl.reciprocal(denom, approx=True)                   # (C, chunk)

        hit = cls_ids == gt                                              # (C, chunk)

        # per-pixel CE: log(sum exp(z)) - z[gt]; zero for ignored / padded pixels.
        # where-selects (value in taken branch) also neutralize NaN/Inf coming from
        # out-of-bounds garbage lanes in a partial trailing logits block.
        zsel = jnp.sum(jnp.where(hit, z, 0.0), axis=0, keepdims=True)    # (1, chunk)
        ce_ref[0, 0, :, lo:lo + chunk] = jnp.where(valid, jnp.log(denom) - zsel, 0.0)

        inter_acc = inter_acc + lane_fold(jnp.where(hit, probs, 0.0))
        psum_acc = psum_acc + lane_fold(jnp.where(valid, probs, 0.0))

    @pl.when(n == 0)
    def _init():
        inter_ref[0, 0] = inter_acc
        psum_ref[0, 0] = psum_acc

    @pl.when(n != 0)
    def _accum():
        inter_ref[0, 0] += inter_acc
        psum_ref[0, 0] += psum_acc


def _run_semantic_kernel(logits_lbcn, gt_b1n, tile, chunk):
    """logits_lbcn: [L, B, C, N_bt] (f32/bf16) ; gt_b1n: [B, 1, n_tiles*tile] i32."""
    L, B, C, N_bt = logits_lbcn.shape
    n_tiles = pl.cdiv(N_bt, tile)

    kernel = functools.partial(_semantic_loss_kernel, tile=tile, chunk=chunk)

    out_shape = (
        jax.ShapeDtypeStruct((L, B, 1, n_tiles * tile), jnp.float32),  # CE per pixel
        jax.ShapeDtypeStruct((L, B, C, 128), jnp.float32),             # dice intersection
        jax.ShapeDtypeStruct((L, B, C, 128), jnp.float32),             # dice pred sum
    )

    grid_spec = pltpu.PrefetchScalarGridSpec(
        num_scalar_prefetch=0,
        grid=(L, B, n_tiles),
        in_specs=[
            # native [L, B, C, pixels] layout, no wrapper transpose, no logits padding
            pl.BlockSpec((1, 1, C, tile), lambda l, b, n: (l, b, 0, n)),
            pl.BlockSpec((1, 1, tile), lambda l, b, n: (b, 0, n)),
        ],
        out_specs=[
            pl.BlockSpec((1, 1, 1, tile), lambda l, b, n: (l, b, 0, n)),
            pl.BlockSpec((1, 1, C, 128), lambda l, b, n: (l, b, 0, 0)),
            pl.BlockSpec((1, 1, C, 128), lambda l, b, n: (l, b, 0, 0)),
        ],
    )

    # explicit VMEM budget (double-buffered blocks + accumulators + headroom),
    # kept under the v7x 64 MiB physical ceiling.
    itemsize = jnp.dtype(logits_lbcn.dtype).itemsize
    block_bytes = C * tile * itemsize + tile * 4 + tile * 4
    vmem_limit = int(min(max(4 * block_bytes + (8 << 20), 32 << 20), 48 << 20))

    return pl.pallas_call(
        kernel,
        out_shape=out_shape,
        grid_spec=grid_spec,
        compiler_params=pltpu.CompilerParams(
            # L and B are independent -> megacore / v7x 2-TC sharding; the pixel-tile
            # axis carries the dice accumulation (arbitrary).
            dimension_semantics=("parallel", "parallel", "arbitrary"),
            vmem_limit_bytes=vmem_limit,
        ),
    )(logits_lbcn, gt_b1n)


def semantic_seg_loss_dense(pred_mask_logits, gt_masks, ignore_masks, *,
                            w_ce=1.0, w_dice=1.0, alpha=0.25):
    """SemanticSegLoss.forward_dense (loss_type='dense').

    pred_mask_logits : [L, B, C, T, H//4, W//4] f32 or bf16
    gt_masks         : [B, T, H, W] int (class ids)
    ignore_masks     : [B, T, H, W] bool
    """
    L, B, C, T, Hd, Wd = pred_mask_logits.shape

    # gt = where(ignore, -100, gt), then 'nearest-exact' x0.25 downsample
    # (src = 4*dst + 2); applied after slicing — identical result, cheaper.
    gt_ds = gt_masks[:, :, 2::4, 2::4].astype(jnp.int32)    # (B, T, Hd, Wd)
    ign_ds = ignore_masks[:, :, 2::4, 2::4]
    gt_ds = jnp.where(ign_ds, IGNORE_INDEX, gt_ds)
    assert gt_ds.shape == (B, T, Hd, Wd)

    N_bt = T * Hd * Wd
    # contiguous reshapes only — no HBM transpose, no padding of logits
    logits = pred_mask_logits.reshape(L, B, C, N_bt)
    gt_flat = gt_ds.reshape(B, 1, N_bt)

    # chunk bounds in-kernel vreg pressure; tile amortizes the per-grid-step overhead
    if C <= 16:
        chunk = 512
    elif C <= 32:
        chunk = 256
    else:
        chunk = 128
    itemsize = jnp.dtype(logits.dtype).itemsize
    bytes_cap = max(chunk, (TARGET_BLOCK_BYTES // (C * itemsize)) // chunk * chunk)
    tile = min(_round_up(N_bt, chunk), MAX_CHUNKS_PER_TILE * chunk, bytes_cap)

    n_tiles = pl.cdiv(N_bt, tile)
    n_pad = n_tiles * tile
    if n_pad != N_bt:
        # pad only gt (tiny, int) with the ignore index; logits stay unpadded and the
        # partial trailing logits block is masked in-kernel via the where-selects.
        gt_flat = jnp.pad(gt_flat, ((0, 0), (0, 0), (0, n_pad - N_bt)),
                          constant_values=IGNORE_INDEX)

    ce, inter, psum = _run_semantic_kernel(logits, gt_flat, tile, chunk)

    # bootstrapped cross entropy: mean of the top alpha-fraction hardest pixels
    # (approximate top-k; exact full-sort top_k dominates wall-clock otherwise)
    ce = ce[:, :, 0, :N_bt].reshape(L, B * N_bt)
    N = B * N_bt
    k = max(int(alpha * N), 1)
    top_ce, _ = lax.approx_max_k(ce, k)                     # (L, k)
    loss_ce = jnp.mean(top_ce, axis=1)                      # (L,)

    # multiclass soft dice (per class over all valid pixels, smooth = 1).
    # gt per-class counts depend only on gt (not the decoder layer) -> computed once
    # in glue instead of L times in the kernel.
    valid_all = gt_ds != IGNORE_INDEX
    gt_safe = jnp.where(valid_all, gt_ds, C).reshape(-1)
    gsum_c = jnp.bincount(gt_safe, length=C + 1)[:C].astype(jnp.float32)   # (C,)

    inter_c = jnp.sum(inter, axis=(1, 3))                   # (L, C)
    psum_c = jnp.sum(psum, axis=(1, 3))                     # (L, C)
    dice = 1.0 - (2.0 * inter_c + 1.0) / (psum_c + gsum_c[None, :] + 1.0)
    loss_dice = jnp.mean(dice, axis=1)                      # (L,)

    loss_total = w_ce * loss_ce + w_dice * loss_dice
    return {
        "loss_semantic_ce": loss_ce,
        "loss_semantic_dice": loss_dice,
        "loss_semantic_total": loss_total,
    }


class PanopticSegLoss:
    """JAX/Pallas port of tarvis PanopticSegLoss (semantic branch)."""

    def __init__(self, num_points_instance=128, num_points_semantic=128,
                 oversample_ratio=3.0, importance_sample_ratio=0.75,
                 semantic_loss_type="dense", semantic_w_ce=1.0,
                 semantic_w_dice=1.0, ignore_null_class_logits=False,
                 semantic_logit_regularization_loss=False):
        assert semantic_loss_type == "dense", \
            "only the 'dense' semantic loss type is implemented"
        self.w_ce = semantic_w_ce
        self.w_dice = semantic_w_dice
        # module has no learnable parameters -> nothing to initialize

    def __call__(self, pred_semantic_mask_logits, gt_semantic_masks, ignore_masks):
        semantic_losses = semantic_seg_loss_dense(
            pred_semantic_mask_logits, gt_semantic_masks, ignore_masks,
            w_ce=self.w_ce, w_dice=self.w_dice)
        combined = dict(semantic_losses)
        # TODO(synk): add instance_losses['loss_total'] once InstanceSegLoss
        # reference implementation is available.
        combined["loss_total"] = semantic_losses["loss_semantic_total"]
        return combined


if __name__ == "__main__":
    key = jax.random.PRNGKey(0)
    k1, k2, k3 = jax.random.split(key, 3)

    # small shapes: L=2 decoder layers, B=2, C=9 (=1+8 classes), T=2, H=64, W=128
    L, B, C, T, H, W = 2, 2, 9, 2, 64, 128
    Hd, Wd = H // 4, W // 4

    pred_semantic_mask_logits = jax.random.normal(
        k1, (L, B, C, T, Hd, Wd), dtype=jnp.float32)
    gt_semantic_masks = jax.random.randint(
        k2, (B, T, H, W), minval=0, maxval=C, dtype=jnp.int32)
    ignore_masks = jax.random.uniform(k3, (B, T, H, W)) < 0.1

    loss_fn = PanopticSegLoss(semantic_loss_type="dense",
                              semantic_w_ce=1.0, semantic_w_dice=1.0)
    losses = loss_fn(pred_semantic_mask_logits, gt_semantic_masks, ignore_masks)
    jax.block_until_ready(losses)
    print("KERNEL_OK")
</pallas_src>

<mosaic_0001>
module attributes {stable_mosaic.version = 11 : i64} {
  func.func @_semantic_loss_kernel(%arg0: i32, %arg1: i32, %arg2: i32, %arg3: memref<1x1x9x1024xf32, #tpu.memory_space<vmem>>, %arg4: memref<1x1x1024xi32, #tpu.memory_space<vmem>>, %arg5: memref<1x1x1x1024xf32, #tpu.memory_space<vmem>>, %arg6: memref<1x1x9x128xf32, #tpu.memory_space<vmem>>, %arg7: memref<1x1x9x128xf32, #tpu.memory_space<vmem>>) attributes {dimension_semantics = [#tpu.dimension_semantics<parallel>, #tpu.dimension_semantics<parallel>, #tpu.dimension_semantics<arbitrary>], iteration_bounds = array<i64: 2, 2, 1>, scalar_prefetch = 0 : i64, scratch_operands = 0 : i64, tpu.core_type = #tpu.core_type<tc>, window_params = [{transform_indices = @transform_0, window_bounds = array<i64: 1, 1, 9, 1024>}, {transform_indices = @transform_1, window_bounds = array<i64: 1, 1, 1024>}, {transform_indices = @transform_2, window_bounds = array<i64: 1, 1, 1, 1024>}, {transform_indices = @transform_3, window_bounds = array<i64: 1, 1, 9, 128>}, {transform_indices = @transform_4, window_bounds = array<i64: 1, 1, 9, 128>}]} {
    %0 = tpu.iota {dimensions = array<i32: 0>} : vector<9x512xi32>
    %cst = arith.constant 0.000000e+00 : f32
    %1 = vector.broadcast %cst : f32 to vector<9x128xf32>
    %cst_0 = arith.constant 0.000000e+00 : f32
    %2 = vector.broadcast %cst_0 : f32 to vector<9x128xf32>
    %c0 = arith.constant 0 : index
    %c0_1 = arith.constant 0 : index
    %c0_2 = arith.constant 0 : index
    %c0_3 = arith.constant 0 : index
    %3 = vector.load %arg3[%c0, %c0_1, %c0_2, %c0_3] : memref<1x1x9x1024xf32, #tpu.memory_space<vmem>>, vector<1x1x9x512xf32>
    %4 = vector.shape_cast %3 : vector<1x1x9x512xf32> to vector<9x512xf32>
    %c0_4 = arith.constant 0 : index
    %c0_5 = arith.constant 0 : index
    %c0_6 = arith.constant 0 : index
    %5 = vector.load %arg4[%c0_4, %c0_5, %c0_6] : memref<1x1x1024xi32, #tpu.memory_space<vmem>>, vector<1x1x512xi32>
    %6 = vector.shape_cast %5 : vector<1x1x512xi32> to vector<1x512xi32>
    %c-100_i32 = arith.constant -100 : i32
    %7 = vector.broadcast %c-100_i32 : i32 to vector<1x512xi32>
    %8 = arith.cmpi ne, %6, %7 : vector<1x512xi32>
    %cst_7 = arith.constant dense<0xFF800000> : vector<512xf32>
    %9 = vector.multi_reduction <maximumf>, %4, %cst_7 [0] : vector<9x512xf32> to vector<512xf32>
    %10 = vector.shape_cast %9 : vector<512xf32> to vector<1x512xf32>
    %11 = vector.broadcast %10 : vector<1x512xf32> to vector<9x512xf32>
    %12 = arith.subf %4, %11 : vector<9x512xf32>
    %13 = math.exp %12 : vector<9x512xf32>
    %cst_8 = arith.constant dense<0.000000e+00> : vector<512xf32>
    %14 = vector.multi_reduction <add>, %13, %cst_8 [0] : vector<9x512xf32> to vector<512xf32>
    %15 = vector.shape_cast %14 : vector<512xf32> to vector<1x512xf32>
    %16 = tpu.reciprocal %15 {approx = true} : vector<1x512xf32> -> vector<1x512xf32>
    %17 = vector.broadcast %16 : vector<1x512xf32> to vector<9x512xf32>
    %18 = arith.mulf %13, %17 : vector<9x512xf32>
    %19 = vector.broadcast %6 : vector<1x512xi32> to vector<9x512xi32>
    %20 = arith.cmpi eq, %0, %19 : vector<9x512xi32>
    %cst_9 = arith.constant 0.000000e+00 : f32
    %21 = vector.broadcast %cst_9 : f32 to vector<9x512xf32>
    %22 = arith.select %20, %12, %21 : vector<9x512xi1>, vector<9x512xf32>
    %cst_10 = arith.constant dense<0.000000e+00> : vector<512xf32>
    %23 = vector.multi_reduction <add>, %22, %cst_10 [0] : vector<9x512xf32> to vector<512xf32>
    %24 = vector.shape_cast %23 : vector<512xf32> to vector<1x512xf32>
    %25 = math.log %15 : vector<1x512xf32>
    %26 = arith.subf %25, %24 : vector<1x512xf32>
    %cst_11 = arith.constant 0.000000e+00 : f32
    %27 = vector.broadcast %cst_11 : f32 to vector<1x512xf32>
    %28 = arith.select %8, %26, %27 : vector<1x512xi1>, vector<1x512xf32>
    %c0_12 = arith.constant 0 : index
    %c0_13 = arith.constant 0 : index
    %c0_14 = arith.constant 0 : index
    %c0_15 = arith.constant 0 : index
    %29 = vector.load %arg5[%c0_12, %c0_13, %c0_14, %c0_15] : memref<1x1x1x1024xf32, #tpu.memory_space<vmem>>, vector<1x1x1x512xf32>
    %30 = vector.shape_cast %29 : vector<1x1x1x512xf32> to vector<1x512xf32>
    %31 = vector.shape_cast %28 : vector<1x512xf32> to vector<1x1x1x512xf32>
    tpu.vector_store %arg5[%c0_12, %c0_13, %c0_14, %c0_15], %31 {strides = array<i32>} : memref<1x1x1x1024xf32, #tpu.memory_space<vmem>>, vector<1x1x1x512xf32>,
    %cst_16 = arith.constant 0.000000e+00 : f32
    %32 = vector.broadcast %cst_16 : f32 to vector<9x512xf32>
    %33 = arith.select %20, %18, %32 : vector<9x512xi1>, vector<9x512xf32>
    %34 = vector.extract_strided_slice %33 {offsets = [0, 0], sizes = [9, 128], strides = [1, 1]} : vector<9x512xf32> to vector<9x128xf32>
    %35 = vector.extract_strided_slice %33 {offsets = [0, 128], sizes = [9, 128], strides = [1, 1]} : vector<9x512xf32> to vector<9x128xf32>
    %36 = arith.addf %34, %35 : vector<9x128xf32>
    %37 = vector.extract_strided_slice %33 {offsets = [0, 256], sizes = [9, 128], strides = [1, 1]} : vector<9x512xf32> to vector<9x128xf32>
    %38 = arith.addf %36, %37 : vector<9x128xf32>
    %39 = vector.extract_strided_slice %33 {offsets = [0, 384], sizes = [9, 128], strides = [1, 1]} : vector<9x512xf32> to vector<9x128xf32>
    %40 = arith.addf %38, %39 : vector<9x128xf32>
    %41 = arith.addf %1, %40 : vector<9x128xf32>
    %cst_17 = arith.constant 0.000000e+00 : f32
    %42 = vector.shape_cast %8 : vector<1x512xi1> to vector<1x512xi1>
    %43 = vector.broadcast %42 : vector<1x512xi1> to vector<9x512xi1>
    %44 = vector.broadcast %cst_17 : f32 to vector<9x512xf32>
    %45 = arith.select %43, %18, %44 : vector<9x512xi1>, vector<9x512xf32>
    %46 = vector.extract_strided_slice %45 {offsets = [0, 0], sizes = [9, 128], strides = [1, 1]} : vector<9x512xf32> to vector<9x128xf32>
    %47 = vector.extract_strided_slice %45 {offsets = [0, 128], sizes = [9, 128], strides = [1, 1]} : vector<9x512xf32> to vector<9x128xf32>
    %48 = arith.addf %46, %47 : vector<9x128xf32>
    %49 = vector.extract_strided_slice %45 {offsets = [0, 256], sizes = [9, 128], strides = [1, 1]} : vector<9x512xf32> to vector<9x128xf32>
    %50 = arith.addf %48, %49 : vector<9x128xf32>
    %51 = vector.extract_strided_slice %45 {offsets = [0, 384], sizes = [9, 128], strides = [1, 1]} : vector<9x512xf32> to vector<9x128xf32>
    %52 = arith.addf %50, %51 : vector<9x128xf32>
    %53 = arith.addf %2, %52 : vector<9x128xf32>
    %c0_18 = arith.constant 0 : index
    %c0_19 = arith.constant 0 : index
    %c0_20 = arith.constant 0 : index
    %c512 = arith.constant 512 : index
    %54 = vector.load %arg3[%c0_18, %c0_19, %c0_20, %c512] : memref<1x1x9x1024xf32, #tpu.memory_space<vmem>>, vector<1x1x9x512xf32>
    %55 = vector.shape_cast %54 : vector<1x1x9x512xf32> to vector<9x512xf32>
    %c0_21 = arith.constant 0 : index
    %c0_22 = arith.constant 0 : index
    %c512_23 = arith.constant 512 : index
    %56 = vector.load %arg4[%c0_21, %c0_22, %c512_23] : memref<1x1x1024xi32, #tpu.memory_space<vmem>>, vector<1x1x512xi32>
    %57 = vector.shape_cast %56 : vector<1x1x512xi32> to vector<1x512xi32>
    %c-100_i32_24 = arith.constant -100 : i32
    %58 = vector.broadcast %c-100_i32_24 : i32 to vector<1x512xi32>
    %59 = arith.cmpi ne, %57, %58 : vector<1x512xi32>
    %cst_25 = arith.constant dense<0xFF800000> : vector<512xf32>
    %60 = vector.multi_reduction <maximumf>, %55, %cst_25 [0] : vector<9x512xf32> to vector<512xf32>
    %61 = vector.shape_cast %60 : vector<512xf32> to vector<1x512xf32>
    %62 = vector.broadcast %61 : vector<1x512xf32> to vector<9x512xf32>
    %63 = arith.subf %55, %62 : vector<9x512xf32>
    %64 = math.exp %63 : vector<9x512xf32>
    %cst_26 = arith.constant dense<0.000000e+00> : vector<512xf32>
    %65 = vector.multi_reduction <add>, %64, %cst_26 [0] : vector<9x512xf32> to vector<512xf32>
    %66 = vector.shape_cast %65 : vector<512xf32> to vector<1x512xf32>
    %67 = tpu.reciprocal %66 {approx = true} : vector<1x512xf32> -> vector<1x512xf32>
    %68 = vector.broadcast %67 : vector<1x512xf32> to vector<9x512xf32>
    %69 = arith.mulf %64, %68 : vector<9x512xf32>
    %70 = vector.broadcast %57 : vector<1x512xi32> to vector<9x512xi32>
    %71 = arith.cmpi eq, %0, %70 : vector<9x512xi32>
    %cst_27 = arith.constant 0.000000e+00 : f32
    %72 = vector.broadcast %cst_27 : f32 to vector<9x512xf32>
    %73 = arith.select %71, %63, %72 : vector<9x512xi1>, vector<9x512xf32>
    %cst_28 = arith.constant dense<0.000000e+00> : vector<512xf32>
    %74 = vector.multi_reduction <add>, %73, %cst_28 [0] : vector<9x512xf32> to vector<512xf32>
    %75 = vector.shape_cast %74 : vector<512xf32> to vector<1x512xf32>
    %76 = math.log %66 : vector<1x512xf32>
    %77 = arith.subf %76, %75 : vector<1x512xf32>
    %cst_29 = arith.constant 0.000000e+00 : f32
    %78 = vector.broadcast %cst_29 : f32 to vector<1x512xf32>
    %79 = arith.select %59, %77, %78 : vector<1x512xi1>, vector<1x512xf32>
    %c0_30 = arith.constant 0 : index
    %c0_31 = arith.constant 0 : index
    %c0_32 = arith.constant 0 : index
    %c512_33 = arith.constant 512 : index
    %80 = vector.load %arg5[%c0_30, %c0_31, %c0_32, %c512_33] : memref<1x1x1x1024xf32, #tpu.memory_space<vmem>>, vector<1x1x1x512xf32>
    %81 = vector.shape_cast %80 : vector<1x1x1x512xf32> to vector<1x512xf32>
    %82 = vector.shape_cast %79 : vector<1x512xf32> to vector<1x1x1x512xf32>
    tpu.vector_store %arg5[%c0_30, %c0_31, %c0_32, %c512_33], %82 {strides = array<i32>} : memref<1x1x1x1024xf32, #tpu.memory_space<vmem>>, vector<1x1x1x512xf32>,
    %cst_34 = arith.constant 0.000000e+00 : f32
    %83 = vector.broadcast %cst_34 : f32 to vector<9x512xf32>
    %84 = arith.select %71, %69, %83 : vector<9x512xi1>, vector<9x512xf32>
    %85 = vector.extract_strided_slice %84 {offsets = [0, 0], sizes = [9, 128], strides = [1, 1]} : vector<9x512xf32> to vector<9x128xf32>
    %86 = vector.extract_strided_slice %84 {offsets = [0, 128], sizes = [9, 128], strides = [1, 1]} : vector<9x512xf32> to vector<9x128xf32>
    %87 = arith.addf %85, %86 : vector<9x128xf32>
    %88 = vector.extract_strided_slice %84 {offsets = [0, 256], sizes = [9, 128], strides = [1, 1]} : vector<9x512xf32> to vector<9x128xf32>
    %89 = arith.addf %87, %88 : vector<9x128xf32>
    %90 = vector.extract_strided_slice %84 {offsets = [0, 384], sizes = [9, 128], strides = [1, 1]} : vector<9x512xf32> to vector<9x128xf32>
    %91 = arith.addf %89, %90 : vector<9x128xf32>
    %92 = arith.addf %41, %91 : vector<9x128xf32>
    %cst_35 = arith.constant 0.000000e+00 : f32
    %93 = vector.shape_cast %59 : vector<1x512xi1> to vector<1x512xi1>
    %94 = vector.broadcast %93 : vector<1x512xi1> to vector<9x512xi1>
    %95 = vector.broadcast %cst_35 : f32 to vector<9x512xf32>
    %96 = arith.select %94, %69, %95 : vector<9x512xi1>, vector<9x512xf32>
    %97 = vector.extract_strided_slice %96 {offsets = [0, 0], sizes = [9, 128], strides = [1, 1]} : vector<9x512xf32> to vector<9x128xf32>
    %98 = vector.extract_strided_slice %96 {offsets = [0, 128], sizes = [9, 128], strides = [1, 1]} : vector<9x512xf32> to vector<9x128xf32>
    %99 = arith.addf %97, %98 : vector<9x128xf32>
    %100 = vector.extract_strided_slice %96 {offsets = [0, 256], sizes = [9, 128], strides = [1, 1]} : vector<9x512xf32> to vector<9x128xf32>
    %101 = arith.addf %99, %100 : vector<9x128xf32>
    %102 = vector.extract_strided_slice %96 {offsets = [0, 384], sizes = [9, 128], strides = [1, 1]} : vector<9x512xf32> to vector<9x128xf32>
    %103 = arith.addf %101, %102 : vector<9x128xf32>
    %104 = arith.addf %53, %103 : vector<9x128xf32>
    %c0_i32 = arith.constant 0 : i32
    %105 = arith.cmpi eq, %arg2, %c0_i32 : i32
    %106 = arith.extui %105 : i1 to i32
    %c0_i32_36 = arith.constant 0 : i32
    %107 = arith.cmpi ne, %106, %c0_i32_36 : i32
    scf.if %107 {
      %c0_39 = arith.constant 0 : index
      %c0_40 = arith.constant 0 : index
      %c0_41 = arith.constant 0 : index
      %c0_42 = arith.constant 0 : index
      %111 = vector.load %arg6[%c0_39, %c0_40, %c0_41, %c0_42] : memref<1x1x9x128xf32, #tpu.memory_space<vmem>>, vector<1x1x9x128xf32>
      %112 = vector.shape_cast %111 : vector<1x1x9x128xf32> to vector<9x128xf32>
      %113 = vector.shape_cast %92 : vector<9x128xf32> to vector<1x1x9x128xf32>
      tpu.vector_store %arg6[%c0_39, %c0_40, %c0_41, %c0_42], %113 {strides = array<i32>} : memref<1x1x9x128xf32, #tpu.memory_space<vmem>>, vector<1x1x9x128xf32>,
      %c0_43 = arith.constant 0 : index
      %c0_44 = arith.constant 0 : index
      %c0_45 = arith.constant 0 : index
      %c0_46 = arith.constant 0 : index
      %114 = vector.load %arg7[%c0_43, %c0_44, %c0_45, %c0_46] : memref<1x1x9x128xf32, #tpu.memory_space<vmem>>, vector<1x1x9x128xf32>
      %115 = vector.shape_cast %114 : vector<1x1x9x128xf32> to vector<9x128xf32>
      %116 = vector.shape_cast %104 : vector<9x128xf32> to vector<1x1x9x128xf32>
      tpu.vector_store %arg7[%c0_43, %c0_44, %c0_45, %c0_46], %116 {strides = array<i32>} : memref<1x1x9x128xf32, #tpu.memory_space<vmem>>, vector<1x1x9x128xf32>,
    } else {
    }
    %c0_i32_37 = arith.constant 0 : i32
    %108 = arith.cmpi ne, %arg2, %c0_i32_37 : i32
    %109 = arith.extui %108 : i1 to i32
    %c0_i32_38 = arith.constant 0 : i32
    %110 = arith.cmpi ne, %109, %c0_i32_38 : i32
    scf.if %110 {
      %c0_39 = arith.constant 0 : index
      %c0_40 = arith.constant 0 : index
      %c0_41 = arith.constant 0 : index
      %c0_42 = arith.constant 0 : index
      %111 = vector.load %arg6[%c0_39, %c0_40, %c0_41, %c0_42] : memref<1x1x9x128xf32, #tpu.memory_space<vmem>>, vector<1x1x9x128xf32>
      %112 = vector.shape_cast %111 : vector<1x1x9x128xf32> to vector<9x128xf32>
      %113 = arith.addf %112, %92 : vector<9x128xf32>
      %c0_43 = arith.constant 0 : index
      %c0_44 = arith.constant 0 : index
      %c0_45 = arith.constant 0 : index
      %c0_46 = arith.constant 0 : index
      %114 = vector.load %arg6[%c0_43, %c0_44, %c0_45, %c0_46] : memref<1x1x9x128xf32, #tpu.memory_space<vmem>>, vector<1x1x9x128xf32>
      %115 = vector.shape_cast %114 : vector<1x1x9x128xf32> to vector<9x128xf32>
      %116 = vector.shape_cast %113 : vector<9x128xf32> to vector<1x1x9x128xf32>
      tpu.vector_store %arg6[%c0_43, %c0_44, %c0_45, %c0_46], %116 {strides = array<i32>} : memref<1x1x9x128xf32, #tpu.memory_space<vmem>>, vector<1x1x9x128xf32>,
      %c0_47 = arith.constant 0 : index
      %c0_48 = arith.constant 0 : index
      %c0_49 = arith.constant 0 : index
      %c0_50 = arith.constant 0 : index
      %117 = vector.load %arg7[%c0_47, %c0_48, %c0_49, %c0_50] : memref<1x1x9x128xf32, #tpu.memory_space<vmem>>, vector<1x1x9x128xf32>
      %118 = vector.shape_cast %117 : vector<1x1x9x128xf32> to vector<9x128xf32>
      %119 = arith.addf %118, %104 : vector<9x128xf32>
      %c0_51 = arith.constant 0 : index
      %c0_52 = arith.constant 0 : index
      %c0_53 = arith.constant 0 : index
      %c0_54 = arith.constant 0 : index
      %120 = vector.load %arg7[%c0_51, %c0_52, %c0_53, %c0_54] : memref<1x1x9x128xf32, #tpu.memory_space<vmem>>, vector<1x1x9x128xf32>
      %121 = vector.shape_cast %120 : vector<1x1x9x128xf32> to vector<9x128xf32>
      %122 = vector.shape_cast %119 : vector<9x128xf32> to vector<1x1x9x128xf32>
      tpu.vector_store %arg7[%c0_51, %c0_52, %c0_53, %c0_54], %122 {strides = array<i32>} : memref<1x1x9x128xf32, #tpu.memory_space<vmem>>, vector<1x1x9x128xf32>,
    } else {
    }
    return
  }
  func.func @transform_0(%arg0: i32, %arg1: i32, %arg2: i32) -> (i32, i32, i32, i32) {
    %c0_i32 = arith.constant 0 : i32
    %c0_i32_0 = arith.constant 0 : i32
    return %arg0, %arg1, %c0_i32, %arg2 : i32, i32, i32, i32
  }
  func.func @transform_1(%arg0: i32, %arg1: i32, %arg2: i32) -> (i32, i32, i32) {
    %c0_i32 = arith.constant 0 : i32
    %c0_i32_0 = arith.constant 0 : i32
    return %arg1, %c0_i32, %arg2 : i32, i32, i32
  }
  func.func @transform_2(%arg0: i32, %arg1: i32, %arg2: i32) -> (i32, i32, i32, i32) {
    %c0_i32 = arith.constant 0 : i32
    %c0_i32_0 = arith.constant 0 : i32
    return %arg0, %arg1, %c0_i32, %arg2 : i32, i32, i32, i32
  }
  func.func @transform_3(%arg0: i32, %arg1: i32, %arg2: i32) -> (i32, i32, i32, i32) {
    %c0_i32 = arith.constant 0 : i32
    %c0_i32_0 = arith.constant 0 : i32
    %c0_i32_1 = arith.constant 0 : i32
    return %arg0, %arg1, %c0_i32, %c0_i32_0 : i32, i32, i32, i32
  }
  func.func @transform_4(%arg0: i32, %arg1: i32, %arg2: i32) -> (i32, i32, i32, i32) {
    %c0_i32 = arith.constant 0 : i32
    %c0_i32_0 = arith.constant 0 : i32
    %c0_i32_1 = arith.constant 0 : i32
    return %arg0, %arg1, %c0_i32, %c0_i32_0 : i32, i32, i32, i32
  }
}

</mosaic_0001>

<bundles_post_ra>
// kernel: tpu_custom_call.1
= control target key start
LH: loop header
LB: loop body
LE: loop exit
PB: predicated region body
PF: predicated region fallthrough
CT: control target
= control target key end

     0   :  { %10 = vsyncpa [#allocation3], 0  ;;  %s2141_s0 = inlined_call_operand.vmem [shape: f32[2,2,9,1024], index: 0, kind: input, shape index: {}]   ;;  %s2142_s1 = inlined_call_operand.vmem [shape: s32[2,1,1024], index: 1, kind: input, shape index: {}]   ;;  %s2143_s2 = inlined_call_operand.hbm [shape: f32[2,2,1,1024], index: 2, kind: output, shape index: {0}]   ;;  %s2144_s3 = inlined_call_operand.vmem [shape: f32[2,2,9,128], index: 3, kind: output, shape index: {1}]   ;;  %s2145_s4 = inlined_call_operand.vmem [shape: f32[2,2,9,128], index: 4, kind: output, shape index: {2}]  }
   0x1   :  { %12 = vsyncpa [#allocation3 + $0x1], 0  ;;  %s1413_s15 = smov 0   ;;  %s1415_s16 = smov 0  }
   0x2   :  { %s1417_s17 = smov 0   ;;  %s1419_s18 = smov 0  }
   0x3   :  { %s1421_s19 = smov 0   ;;  %s1423_s20 = smov 0  }
   0x4   :  { %s1425_s21 = smov 0   ;;  %s1427_s22 = smov 0  }
   0x5 LB: > { %s1130_s23 = sadd.s32 4294967295, %s1383_s22   ;;  %s1131_s24 = sadd.s32 4294967294, %s1383_s22   ;;  %s1383_s22 = sphi %s1427_s22, %s18_s22   ;;  %s1379_s21 = sphi %s1425_s21, %s2206_s21   ;;  %s1375_s20 = sphi %s1423_s20, %s2205_s20   ;;  %s1371_s19 = sphi %s1421_s19, %s2204_s19   ;;  %s1367_s18 = sphi %s1419_s18, %s2203_s18   ;;  %s1363_s17 = sphi %s1417_s17, %s2202_s17   ;;  %s1359_s16 = sphi %s1415_s16, %s2201_s16   ;;  %s1355_s15 = sphi %s1413_s15, %s2200_s15  }
   0x6   : > { %s33_s25 = sadd.s32 1, %s1375_s20  ;;  %s37_s26 = sadd.s32 1, %s1379_s21 }
   0x7   : > { %p35_p0 = scmp.ge.s32.totalorder %s33_s25, 2  ;;  %p116_p1 = scmp.ne.s32.totalorder %s1363_s17, %s1359_s16 }
   0x8   : > { %p117_p2 = scmp.eq.s32.totalorder %s1130_s23, 3  ;;  %p122_p5 = scmp.ne.s32.totalorder %s1359_s16, %s1355_s15 }
   0x9   : > { %s2208_s25 = smov (%p35_p0, %s33_s25), 0  ;;  %s2210_s26 = smov (!%p35_p0, %s37_s26), %s1379_s21 }
   0xa   : > { %s100_s27 = ssub.s32 %s1375_s20, %s2208_s25  ;;  %p1464_p3 = por %p117_p2, %p116_p1 }
   0xb   : > { %p39_p4 = scmp.ge.s32.totalorder %s2210_s26, 2  ;;  %p123_p6 = scmp.eq.s32.totalorder %s1131_s24, 3 }
   0xc   : > { %p1134_p7 = scmp.ge.s32.totalorder %s1383_s22, 1  ;;  %p226_p9 = scmp.lt.s32.totalorder %s1383_s22, 5 }
   0xd   : > { %s2212_s26 = smov (%p39_p4, %s2210_s26), 0  ;;  %p1473_p8 = por %p123_p6, %p122_p5 }
   0xe   : > { %2162 = sst [smem:[#allocation5_spill]] %s2212_s26  ;;  %s99_s30 = ssub.s32 %s1379_s21, %s2212_s26 }
   0xf   : > { %s106_s5 = sadd.s32 1, %s1363_s17  ;;  %s101_s6 = sor.u32 %s100_s27, %s99_s30 }
  0x10   : > { %p227_p10 = pnand %p1134_p7, %p226_p9  ;;  %p104_p11 = scmp.eq.s32.totalorder %s101_s6, 0 }
  0x12   : > { %s1482_s7 = scalar_select %p104_p11, %s1363_s17, %s106_s5  }
  0x13   : > { %230 = sbr.rel (%p227_p10) target bundleno = 164 (0xa4), region = 28 }
  0x1a   : > { %p287_p12 = scmp.lt.s32.totalorder %s1371_s19, 1  ;;  %p289_p13 = scmp.lt.s32.totalorder %s1367_s18, 1  ;;  %v2154_v0 = vlaneseq  ;;  %v1385_v2 = vmov 1966171168   ;;  %vm341_vm0 = vcmask 1040384   ;;  %v2147_v30 = vmov 0  }
  0x1b   : > { %v525_v3 = vunpack.c.l.s4 %v1385_v2  ;;  %s261_s26 = sand.u32 1, %s1359_s16   ;;  %s1387_s23 = smov [#allocation2]  }
  0x1c   : > { %s288_s8 = scalar_select %p287_p12, %s1371_s19, 1  ;;  %v1489_v1 = vshrl.u32 %v2154_v0, 7 }
  0x1d   : > { %s290_s9 = scalar_select %p289_p13, %s1367_s18, 1  ;;  %v526_v15 = vunpack.c.0.s8 %v525_v3 }
  0x1e   : > { %s1137_s10 = sshll.u32 %s288_s8, 5  ;;  %s1141_s11 = sshll.u32 %s288_s8, 2  ;;  %v1507_v5 = vsub.s32 0, %v1489_v1  ;;  %v1519_v9 = vsub.s32 1, %v1489_v1  ;;  %v1522_v10 = vsub.s32 2, %v1489_v1  ;;  %v1525_v11 = vsub.s32 3, %v1489_v1 }
  0x1f   : > { %s1136_s12 = sshll.u32 %s290_s9, 4  ;;  %s1139_s13 = sshll.u32 %s290_s9, 3  ;;  %v1554_v24 = vadd.s32 8, %v1489_v1  ;;  %v1559_v29 = vsub.s32 %v526_v15, %v1489_v1 }
  0x20   : > { %s296_s14 = sadd.s32 %s1137_s10, %s1136_s12  ;;  %s1494_s27 = scalar_lea.vmem %s2142_s1, %s1139_s13 }
  0x21   : > { %s1138_s30 = sshll.u32 %s296_s14, 3  ;;  %s1140_s5 = sshll.u32 %s290_s9, 1  ;;  %v1504_v4 = vld [vmem:[%s1494_s27] sm:$0xf]  ;;  %v1567_v32 = vld [vmem:[%s1494_s27 + $0x4] sm:$0xf] }
  0x22   : > { %s1499_s8 = scalar_lea.vmem %s2141_s0, %s1138_s30  ;;  %s1501_s10 = sadd.s32 %s1141_s11, %s1140_s5  ;;  %vm2148_vm1 = vcmp.ne.s32.totalorder %v1504_v4, 4294967196  ;;  %v1571_v35 = vrot.slane %v1504_v4, %v1507_v5  ;;  %v1575_v36 = vrot.slane %v1504_v4, %v1519_v9  ;;  %v1585_v41 = vrot.slane %v1504_v4, %v1522_v10 }
  0x23   : > { %v1510_v6 = vld [vmem:[%s1499_s8] sm:$0xff]  ;;  %v1513_v7 = vld [vmem:[%s1499_s8 + $0x8] sm:$0xff]  ;;  %v1516_v8 = vld [vmem:[%s1499_s8 + $0x10] sm:$0xff]  ;;  %v1564_v31 = vsel %vm2148_vm1, 1, %v2147_v30  ;;  %v1589_v42 = vrot.slane %v1504_v4, %v1525_v11  ;;  %v1607_v50 = vrot.slane %v1567_v32, %v1507_v5  ;;  %s1135_s9 = sshll.u32 %s261_s26, 3  ;;  %s1142_s12 = sshll.u32 %s1501_s10, 3 }
  0x24   : > { %v1528_v12 = vld [vmem:[%s1499_s8 + $0x18] sm:$0xff]  ;;  %v1531_v13 = vld [vmem:[%s1499_s8 + $0x40] sm:$0x1]  ;;  %v1534_v14 = vld [vmem:[%s1499_s8 + $0x48] sm:$0x1]  ;;  %v573_v47 = vrot.slane %v1564_v31, %v1507_v5  ;;  %vm458_vm2 = vcmp.eq.s32.totalorder %v1489_v1, %v1571_v35  ;;  %vm459_vm3 = vcmp.eq.s32.totalorder %v1489_v1, %v1575_v36  ;;  %vm460_vm4 = vcmp.eq.s32.totalorder %v1489_v1, %v1585_v41  ;;  %s1980_s11 = scalar_lea.vmem [#allocation2], %s1135_s9  ;;  %s318_s27 = scalar_lea.vmem %s2144_s3, %s1142_s12 }
  0x25   : > { %v1538_v16 = vld [vmem:[%s1499_s8 + $0x50] sm:$0x1]  ;;  %v1541_v17 = vld [vmem:[%s1499_s8 + $0x58] sm:$0x1]  ;;  %v342_v18 = vsel %vm341_vm0, %v1531_v13, -inf  ;;  %v350_v19 = vsel %vm341_vm0, %v1534_v14, -inf  ;;  %vm461_vm5 = vcmp.eq.s32.totalorder %v1489_v1, %v1589_v42  ;;  %vm462_vm6 = vcmp.eq.s32.totalorder %v1554_v24, %v1571_v35 }
  0x26   : > { %v343_v20 = vmax.f32 %v1510_v6, %v342_v18  ;;  %v351_v21 = vmax.f32 %v1513_v7, %v350_v19  ;;  %v358_v22 = vsel %vm341_vm0, %v1538_v16, -inf  ;;  %v366_v23 = vsel %vm341_vm0, %v1541_v17, -inf  ;;  %v1578_v37 = vld [vmem:[%s1499_s8 + $0x60] sm:$0x1]  ;;  %v1581_v38 = vld [vmem:[%s1499_s8 + $0x68] sm:$0x1] }
  0x27   : > { %v359_v25 = vmax.f32 %v1516_v8, %v358_v22  ;;  %v367_v26 = vmax.f32 %v1528_v12, %v366_v23  ;;  %v1592_v43 = vld [vmem:[%s1499_s8 + $0x20] sm:$0xff]  ;;  %v1595_v44 = vld [vmem:[%s1499_s8 + $0x28] sm:$0xff]  ;;  %v1600_v48 = vld [vmem:[%s1499_s8 + $0x70] sm:$0x1]  ;;  %v616_v53 = vsel %vm341_vm0, %v1578_v37, -inf  ;;  %v624_v54 = vsel %vm341_vm0, %v1581_v38, -inf }
  0x28   : > { %v344_v27 = vrot.slane %v343_v20, 4  ;;  %v352_v28 = vrot.slane %v351_v21, 4  ;;  %v1603_v49 = vld [vmem:[%s1499_s8 + $0x78] sm:$0x1]  ;;  %v1616_v57 = vld [vmem:[%s1499_s8 + $0x30] sm:$0xff]  ;;  %v617_v59 = vmax.f32 %v1592_v43, %v616_v53  ;;  %v625_v60 = vmax.f32 %v1595_v44, %v624_v54  ;;  %s1147_s13 = sshll.u32 %s1367_s18, 3 }
  0x29   : > { %v360_v33 = vrot.slane %v359_v25, 4  ;;  %v368_v34 = vrot.slane %v367_v26, 4  ;;  %v1619_v58 = vld [vmem:[%s1499_s8 + $0x38] sm:$0xff]  ;;  %v632_v63 = vsel %vm341_vm0, %v1600_v48, -inf  ;;  %v640_v2 = vsel %vm341_vm0, %v1603_v49, -inf  ;;  %s1148_s14 = sshll.u32 %s1371_s19, 4  ;;  %s327_s8 = scalar_lea.vmem %s2145_s4, %s1142_s12 }
  0x2a   : > { %v345_v39 = vmax.f32 %v343_v20, %v344_v27  ;;  %v353_v40 = vmax.f32 %v351_v21, %v352_v28  ;;  %vm463_vm7 = vcmp.eq.s32.totalorder %v1554_v24, %v1575_v36  ;;  %vm464_vm8 = vcmp.eq.s32.totalorder %v1554_v24, %v1585_v41  ;;  %s933_s18 = sadd.s32 %s1148_s14, %s1147_s13  ;;  %s937_s30 = sshll.u32 %s1980_s11, 4  ;;  %s2083_s30 = int_to_ptr.vmem [resolvable:$true] %s937_s30 }
  0x2b   : > { %v361_v45 = vmax.f32 %v359_v25, %v360_v33  ;;  %v369_v46 = vmax.f32 %v367_v26, %v368_v34  ;;  %v618_v18 = vrot.slane %v617_v59, 4  ;;  %v626_v19 = vrot.slane %v625_v60, 4  ;;  %s1149_s19 = sshll.u32 %s933_s18, 4  ;;  %s901_s10 = scalar_lea.sflag [#allocation3], %s261_s26 }
  0x2c   : > { %v346_v51 = vrot.slane %v345_v39, 2  ;;  %v354_v52 = vrot.slane %v353_v40, 2  ;;  %vm2149_vm9 = vcmp.eq.s32.totalorder %v1554_v24, %v1589_v42  ;;  %v1642_v22 = vmax.f32 %v1616_v57, %v632_v63  ;;  %s2081_s14 = scalar_lea.hbm %s2143_s2, %s1149_s19  ;;  %s1289_s12 = scalar_lea.vmem %s2083_s30, 128 }
  0x2d   : > { %v362_v55 = vrot.slane %v361_v45, 2  ;;  %v370_v56 = vrot.slane %v369_v46, 2  ;;  %v1645_v23 = vmax.f32 %v1619_v58, %v640_v2  ;;  %v619_v27 = vmax.f32 %v617_v59, %v618_v18  ;;  %p1290_p0 = scmp.ne.s32.totalorder %s2083_s30, %s1289_s12  ;;  %s1293_s24 = sshll.u32 %s1387_s23, 4  ;;  %s1294_s24 = int_to_ptr.vmem [resolvable:$false] %s1293_s24 }
  0x2e   : > { %v347_v61 = vmax.f32 %v345_v39, %v346_v51  ;;  %v355_v62 = vmax.f32 %v353_v40, %v354_v52  ;;  %v627_v28 = vmax.f32 %v625_v60, %v626_v19  ;;  %v634_v39 = vrot.slane %v1642_v22, 4  ;;  %p1296_p4 = scmp.lt.s32.totalorder %s2083_s30, %s1294_s24 }
  0x2f   : > { %v363_v3 = vmax.f32 %v361_v45, %v362_v55  ;;  %v371_v15 = vmax.f32 %v369_v46, %v370_v56  ;;  %v642_v40 = vrot.slane %v1645_v23, 4  ;;  %v620_v51 = vrot.slane %v619_v27, 2  ;;  %p1291_p1 = pnand %p1290_p0, %p1464_p3 }
  0x30   : > { %v348_v20 = vrot.slane %v347_v61, 1  ;;  %v356_v21 = vrot.slane %v355_v62, 1  ;;  %v628_v52 = vrot.slane %v627_v28, 2  ;;  %vm732_vm10 = vcmp.eq.s32.totalorder %v1489_v1, %v1607_v50 }
  0x31   : > { %v364_v25 = vrot.slane %v363_v3, 1  ;;  %v372_v26 = vrot.slane %v371_v15, 1  ;;  %vm736_vm13 = vcmp.eq.s32.totalorder %v1554_v24, %v1607_v50  ;;  %p1292_p2 = pneg %p1291_p1 }
  0x32   : > { %v349_v33 = vmax.f32 %v347_v61, %v348_v20  ;;  %v357_v34 = vmax.f32 %v355_v62, %v356_v21 }
  0x33   : > { %v365_v45 = vmax.f32 %v363_v3, %v364_v25  ;;  %v373_v46 = vmax.f32 %v371_v15, %v372_v26  ;;  %v621_v15 = vmax.f32 %v619_v27, %v620_v51 }
  0x34   : > { %v374_v53 = vsub.f32 %v1510_v6, %v349_v33  ;;  %v375_v54 = vsub.f32 %v1513_v7, %v357_v34  ;;  %v378_v55 = vsub.f32 %v1531_v13, %v349_v33  ;;  %v379_v56 = vsub.f32 %v1534_v14, %v357_v34 }
  0x35   : > { %v376_v59 = vsub.f32 %v1516_v8, %v365_v45  ;;  %v377_v60 = vsub.f32 %v1528_v12, %v373_v46  ;;  %v380_v61 = vsub.f32 %v1538_v16, %v365_v45  ;;  %v381_v62 = vsub.f32 %v1541_v17, %v373_v46 }
  0x36   : > { %v382_v63 = vmul.f32 1.442695, %v374_v53  ;;  %v384_v2 = vmul.f32 1.442695, %v375_v54  ;;  %v390_v3 = vmul.f32 1.442695, %v378_v55  ;;  %v629_v7 = vmax.f32 %v627_v28, %v628_v52 }
  0x37   : > { %v386_v18 = vmul.f32 1.442695, %v376_v59  ;;  %v388_v6 = vmul.f32 1.442695, %v377_v60  ;;  %v392_v19 = vmul.f32 1.442695, %v379_v56 }
  0x38   : > { %1225 = vpow2.f32 %v382_v63  ;;  %v394_v13 = vmul.f32 1.442695, %v380_v61  ;;  %v396_v20 = vmul.f32 1.442695, %v381_v62  ;;  %v466_v8 = vsel %vm458_vm2, %v374_v53, 0.0 }
  0x39   : > { %1227 = vpow2.f32 %v384_v2  ;;  %v467_v12 = vsel %vm459_vm3, %v375_v54, 0.0  ;;  %v468_v14 = vsel %vm460_vm4, %v376_v59, 0.0  ;;  %v469_v16 = vsel %vm461_vm5, %v377_v60, 0.0 }
  0x3a   : > { %1229 = vpow2.f32 %v386_v18  ;;  %v470_v17 = vsel %vm462_vm6, %v378_v55, 0.0  ;;  %v471_v21 = vsel %vm463_vm7, %v379_v56, 0.0  ;;  %v472_v25 = vsel %vm464_vm8, %v380_v61, 0.0 }
  0x3b   : > { %1231 = vpow2.f32 %v388_v6  ;;  %v473_v26 = vsel %vm2149_vm9, %v381_v62, 0.0  ;;  %v474_v27 = vsel %vm341_vm0, %v470_v17, 0.0  ;;  %v482_v28 = vsel %vm341_vm0, %v471_v21, 0.0 }
  0x3c   : > { %1233 = vpow2.f32 %v390_v3  ;;  %v475_v33 = vadd.f32 %v474_v27, %v466_v8  ;;  %v483_v34 = vadd.f32 %v482_v28, %v467_v12  ;;  %v490_v45 = vsel %vm341_vm0, %v472_v25, 0.0 }
  0x3d   : > { %1235 = vpow2.f32 %v392_v19  ;;  %v491_v46 = vadd.f32 %v490_v45, %v468_v14  ;;  %v498_v51 = vsel %vm341_vm0, %v473_v26, 0.0  ;;  %v622_v52 = vrot.slane %v621_v15, 1 }
  0x3e   : > { %1237 = vpow2.f32 %v394_v13  ;;  %v476_v53 = vrot.slane %v475_v33, 4  ;;  %v484_v54 = vrot.slane %v483_v34, 4  ;;  %v499_v55 = vadd.f32 %v498_v51, %v469_v16 }
  0x3f   : > { %1239 = vpow2.f32 %v396_v20  ;;  %v492_v56 = vrot.slane %v491_v46, 4  ;;  %v623_v59 = vmax.f32 %v621_v15, %v622_v52  ;;  %v630_v60 = vrot.slane %v629_v7, 1 }
  0x40   : > { %v477_v61 = vadd.f32 %v476_v53, %v475_v33  ;;  %v485_v62 = vadd.f32 %v484_v54, %v483_v34  ;;  %v500_v63 = vrot.slane %v499_v55, 4  ;;  %v635_v2 = vmax.f32 %v1642_v22, %v634_v39 }
  0x41   : > { %v493_v3 = vadd.f32 %v492_v56, %v491_v46  ;;  %v631_v18 = vmax.f32 %v629_v7, %v630_v60  ;;  %v643_v6 = vmax.f32 %v1645_v23, %v642_v40  ;;  %v1688_v19 = vsub.f32 %v1592_v43, %v623_v59 }
  0x42   : > { %v1690_v13 = vpop.eup %1225  ;;  %v478_v8 = vrot.slane %v477_v61, 2  ;;  %v486_v12 = vrot.slane %v485_v62, 2  ;;  %v501_v20 = vadd.f32 %v500_v63, %v499_v55  ;;  %v636_v14 = vrot.slane %v635_v2, 2 }
  0x43   : > { %v1692_v15 = vpop.eup %1227  ;;  %v494_v16 = vrot.slane %v493_v3, 2  ;;  %v577_v17 = vrot.slane %v1564_v31, %v1519_v9  ;;  %v581_v22 = vrot.slane %v1564_v31, %v1522_v10  ;;  %v644_v39 = vrot.slane %v643_v6, 2 }
  0x44   : > { %v1698_v23 = vpop.eup %1229  ;;  %v479_v43 = vadd.f32 %v478_v8, %v477_v61  ;;  %v487_v40 = vadd.f32 %v486_v12, %v485_v62  ;;  %v502_v7 = vrot.slane %v501_v20, 2  ;;  %v637_v21 = vmax.f32 %v635_v2, %v636_v14 }
  0x45   : > { %v1700_v25 = vpop.eup %1231  ;;  %v495_v26 = vadd.f32 %v494_v16, %v493_v3  ;;  %v585_v27 = vrot.slane %v1564_v31, %v1525_v11  ;;  %v645_v28 = vmax.f32 %v643_v6, %v644_v39  ;;  %v656_v33 = vmul.f32 1.442695, %v1688_v19 }
  0x46   : > { %v1705_v34 = vpop.eup %1233  ;;  %v480_v45 = vrot.slane %v479_v43, 1  ;;  %v638_v46 = vrot.slane %v637_v21, 1  ;;  %v1708_v51 = vsub.f32 %v1595_v44, %v631_v18  ;;  %v1711_v52 = vsub.f32 %v1578_v37, %v623_v59 }
  0x47   : > { %v1713_v53 = vpop.eup %1235  ;;  %v398_v54 = vsel %vm341_vm0, %v1705_v34, 0.0  ;;  %v488_v55 = vrot.slane %v487_v40, 1  ;;  %v646_v56 = vrot.slane %v645_v28, 1  ;;  %v1718_v60 = vsub.f32 %v1581_v38, %v631_v18 }
  0x48   : > { %v1720_v61 = vpop.eup %1237  ;;  %v399_v62 = vadd.f32 %v1690_v13, %v398_v54  ;;  %v406_v44 = vsel %vm341_vm0, %v1713_v53, 0.0  ;;  %v496_v63 = vrot.slane %v495_v26, 1  ;;  %v1725_v37 = vadd.f32 %v502_v7, %v501_v20 }
  0x49   : > { %v1727_v59 = vpop.eup %1239  ;;  %v407_v2 = vadd.f32 %v1692_v15, %v406_v44  ;;  %v414_v3 = vsel %vm341_vm0, %v1720_v61, 0.0  ;;  %v1732_v6 = vadd.f32 %v480_v45, %v479_v43  ;;  %1241 = vpow2.f32 %v656_v33 }
  0x4a   : > { %v400_v38 = vrot.slane %v399_v62, 4  ;;  %v415_v18 = vadd.f32 %v1698_v23, %v414_v3  ;;  %v422_v8 = vsel %vm341_vm0, %v1727_v59, 0.0  ;;  %v639_v12 = vmax.f32 %v637_v21, %v638_v46 }
  0x4b   : > { %v408_v14 = vrot.slane %v407_v2, 4  ;;  %v423_v20 = vadd.f32 %v1700_v25, %v422_v8  ;;  %v1738_v16 = vadd.f32 %v488_v55, %v487_v40  ;;  %v647_v39 = vmax.f32 %v645_v28, %v646_v56 }
  0x4c   : > { %v401_v7 = vadd.f32 %v400_v38, %v399_v62  ;;  %v416_v54 = vrot.slane %v415_v18, 4  ;;  %v1740_v44 = vadd.f32 %v496_v63, %v495_v26  ;;  %v650_v43 = vsub.f32 %v1616_v57, %v639_v12 }
  0x4d   : > { %v409_v33 = vadd.f32 %v408_v14, %v407_v2  ;;  %v424_v45 = vrot.slane %v423_v20, 4  ;;  %v1744_v3 = vsub.f32 %v1619_v58, %v647_v39  ;;  %v654_v30 = vsub.f32 %v1600_v48, %v639_v12 }
  0x4e   : > { %v402_v21 = vrot.slane %v401_v7, 2  ;;  %v417_v46 = vadd.f32 %v416_v54, %v415_v18  ;;  %v658_v8 = vmul.f32 1.442695, %v1708_v51  ;;  %v660_v40 = vmul.f32 1.442695, %v650_v43 }
  0x4f   : > { %v410_v55 = vrot.slane %v409_v33, 2  ;;  %v425_v28 = vadd.f32 %v424_v45, %v423_v20  ;;  %v504_v56 = vrot.slane %v1725_v37, 1  ;;  %v664_v26 = vmul.f32 1.442695, %v1711_v52 }
  0x50   : > { %v403_v62 = vadd.f32 %v402_v21, %v401_v7  ;;  %v418_v57 = vrot.slane %v417_v46, 2  ;;  %v655_v63 = vsub.f32 %v1603_v49, %v647_v39  ;;  %v666_v58 = vmul.f32 1.442695, %v1718_v60 }
  0x51   : > { %v411_v2 = vadd.f32 %v410_v55, %v409_v33  ;;  %v426_v38 = vrot.slane %v425_v28, 2  ;;  %1243 = vpow2.f32 %v658_v8  ;;  %v668_v48 = vmul.f32 1.442695, %v654_v30 }
  0x52   : > { %v404_v18 = vrot.slane %v403_v62, 1  ;;  %v419_v12 = vadd.f32 %v418_v57, %v417_v46  ;;  %1245 = vpow2.f32 %v660_v40  ;;  %v662_v14 = vmul.f32 1.442695, %v1744_v3 }
  0x53   : > { %v1753_v20 = vpop.eup %1241  ;;  %v412_v54 = vrot.slane %v411_v2, 1  ;;  %v427_v45 = vadd.f32 %v426_v38, %v425_v28  ;;  %1247 = vpow2.f32 %v664_v26  ;;  %v1757_v7 = vrot.slane %v1567_v32, %v1519_v9 }
  0x54   : > { %v405_v49 = vadd.f32 %v404_v18, %v403_v62  ;;  %v420_v39 = vrot.slane %v419_v12, 1  ;;  %1249 = vpow2.f32 %v666_v58  ;;  %v1761_v33 = vrot.slane %v1567_v32, %v1522_v10 }
  0x55   : > { %2164 = vst [vmem:[#allocation6_spill] sm:$0xff] %v1757_v7  ;;  %v413_v21 = vadd.f32 %v412_v54, %v411_v2  ;;  %v428_v46 = vrot.slane %v427_v45, 1  ;;  %1251 = vpow2.f32 %v668_v48  ;;  %v1765_v8 = vrot.slane %v1567_v32, %v1525_v11 }
  0x56   : > { %2165 = vst [vmem:[#allocation7_spill] sm:$0xff] %v1761_v33  ;;  %v421_v40 = vadd.f32 %v420_v39, %v419_v12  ;;  %1253 = vrcp.f32 %v405_v49  ;;  %v670_v55 = vmul.f32 1.442695, %v655_v63  ;;  %vm733_vm11 = vcmp.eq.s32.totalorder %v1489_v1, %v1757_v7 }
  0x57   : > { %2166 = vst [vmem:[#allocation8_spill] sm:$0xff] %v1765_v8  ;;  %v429_v28 = vadd.f32 %v428_v46, %v427_v45  ;;  %1255 = vrcp.f32 %v413_v21  ;;  %vm2150_vm12 = vcmp.eq.s32.totalorder %v1489_v1, %v1761_v33  ;;  %vm2153_vm14 = vcmp.eq.s32.totalorder %v1554_v24, %v1757_v7 }
  0x58   : > { %1257 = vrcp.f32 %v421_v40  ;;  %vm2152_vm15 = vcmp.eq.s32.totalorder %v1554_v24, %v1761_v33  ;;  %vm735_vm1 = vcmp.eq.s32.totalorder %v1489_v1, %v1765_v8  ;;  %vm2151_vm9 = vcmp.eq.s32.totalorder %v1554_v24, %v1765_v8 }
  0x59   : > { %1259 = vrcp.f32 %v429_v28  ;;  %v740_v26 = vsel %vm732_vm10, %v1688_v19, 0.0  ;;  %v741_v62 = vsel %vm733_vm11, %v1708_v51, 0.0  ;;  %v742_v57 = vsel %vm2150_vm12, %v650_v43, 0.0 }
  0x5a   : > { %1261 = vlog2.f32 %v405_v49  ;;  %v744_v58 = vsel %vm736_vm13, %v1711_v52, 0.0  ;;  %v745_v19 = vsel %vm2153_vm14, %v1718_v60, 0.0  ;;  %v746_v51 = vsel %vm2152_vm15, %v654_v30, 0.0 }
  0x5b   : > { %v1798_v2 = vpop.eup %1243  ;;  %1263 = vlog2.f32 %v413_v21  ;;  %v747_v43 = vsel %vm2151_vm9, %v655_v63, 0.0  ;;  %vm1815_vm12 = vcmp.eq.s32.totalorder %v573_v47, 1  ;;  %v748_v60 = vsel %vm341_vm0, %v744_v58, 0.0 }
  0x5c   : > { %v1810_v38 = vpop.eup %1245  ;;  %1265 = vlog2.f32 %v421_v40  ;;  %v756_v48 = vsel %vm341_vm0, %v745_v19, 0.0  ;;  %v764_v30 = vsel %vm341_vm0, %v746_v51, 0.0  ;;  %vm1827_vm9 = vcmp.eq.s32.totalorder %v577_v17, 1 }
  0x5d   : > { %v1822_v18 = vpop.eup %1247  ;;  %1267 = vlog2.f32 %v429_v28  ;;  %v1831_v47 = vadd.f32 %v748_v60, %v740_v26  ;;  %v1833_v12 = vadd.f32 %v756_v48, %v741_v62  ;;  %v1835_v54 = vadd.f32 %v764_v30, %v742_v57 }
  0x5e   : > { %v1837_v45 = vpop.eup %1249  ;;  %v1842_v49 = vadd.f32 %v504_v56, %v1725_v37  ;;  %vm1847_vm15 = vcmp.eq.s32.totalorder %v581_v22, 1  ;;  %vm1854_vm14 = vcmp.eq.s32.totalorder %v585_v27, 1  ;;  %1269 = vpow2.f32 %v662_v14 }
  0x5f   : > { %v672_v21 = vsel %vm341_vm0, %v1822_v18, 0.0  ;;  %v1864_v37 = vsel %vm735_vm1, %v1744_v3, 0.0  ;;  %v1866_v22 = vpop.eup %1251  ;;  %1271 = vpow2.f32 %v670_v55  ;;  %v680_v31 = vsel %vm341_vm0, %v1837_v45, 0.0 }
  0x60   : > { %v1869_v56 = vadd.f32 %v1753_v20, %v672_v21  ;;  %v1874_v27 = vsel %vm341_vm0, %v747_v43, 0.0  ;;  %v1254_v14 = vpop.eup %1253  ;;  %v1877_v46 = vadd.f32 %v1798_v2, %v680_v31  ;;  %v688_v3 = vsel %vm341_vm0, %v1866_v22, 0.0 }
  0x61   : > { %v1256_v28 = vpop.eup %1255  ;;  %v434_v26 = vmul.f32 %v1254_v14, %v1690_v13  ;;  %v438_v62 = vmul.f32 %v1254_v14, %v1705_v34  ;;  %v689_v48 = vadd.f32 %v1810_v38, %v688_v3 }
  0x62   : > { %v674_v57 = vrot.slane %v1869_v56, 4  ;;  %v1258_v19 = vpop.eup %1257  ;;  %v435_v51 = vmul.f32 %v1256_v28, %v1692_v15  ;;  %v439_v43 = vmul.f32 %v1256_v28, %v1713_v53  ;;  %v682_v60 = vrot.slane %v1877_v46, 4 }
  0x63   : > { %v1260_v30 = vpop.eup %1259  ;;  %v436_v21 = vmul.f32 %v1258_v19, %v1698_v23  ;;  %v440_v13 = vmul.f32 %v1258_v19, %v1720_v61  ;;  %v553_v34 = vsel %vm458_vm2, %v434_v26, 0.0  ;;  %v557_v31 = vsel %vm462_vm6, %v438_v62, 0.0 }
  0x64   : > { %v1262_v15 = vpop.eup %1261  ;;  %v437_v53 = vmul.f32 %v1260_v30, %v1700_v25  ;;  %v441_v14 = vmul.f32 %v1260_v30, %v1727_v59  ;;  %v554_v3 = vsel %vm459_vm3, %v435_v51, 0.0  ;;  %v558_v23 = vsel %vm463_vm7, %v439_v43, 0.0 }
  0x65   : > { %v1264_v61 = vpop.eup %1263  ;;  %v507_v28 = vmul.f32 0.6931472, %v1262_v15  ;;  %v555_v35 = vsel %vm460_vm4, %v436_v21, 0.0  ;;  %v559_v25 = vsel %vm464_vm8, %v440_v13, 0.0  ;;  %v561_v19 = vadd.f32 %v554_v3, %v553_v34 }
  0x66   : > { %v1266_v59 = vpop.eup %1265  ;;  %v509_v30 = vmul.f32 0.6931472, %v1264_v61  ;;  %v556_v58 = vsel %vm461_vm5, %v437_v53, 0.0  ;;  %vm2175_vm2 = vcmp.eq.s32.totalorder %v1554_v24, %v1589_v42  ;;  %v562_v15 = vadd.f32 %v558_v23, %v557_v31 }
  0x67   : > { %v560_v36 = vsel %vm2175_vm2, %v441_v14, 0.0  ;;  %v1268_v55 = vpop.eup %1267  ;;  %v511_v40 = vmul.f32 0.6931472, %v1266_v59  ;;  %v514_v0 = vsub.f32 %v507_v28, %v1732_v6  ;;  %v563_v8 = vadd.f32 %v561_v19, %v555_v35 }
  0x68   : > { %v590_v41 = vsel %vm1815_vm12, %v434_v26, 0.0  ;;  %v1922_v34 = vpop.eup %1269  ;;  %v513_v3 = vmul.f32 0.6931472, %v1268_v55  ;;  %v515_v61 = vsub.f32 %v509_v30, %v1738_v16  ;;  %v564_v33 = vadd.f32 %v562_v15, %v559_v25 }
  0x69   : > { %v591_v42 = vsel %vm1827_vm9, %v435_v51, 0.0  ;;  %v1927_v7 = vpop.eup %1271  ;;  %v516_v31 = vsub.f32 %v511_v40, %v1740_v44  ;;  %v1930_v23 = vadd.f32 %v563_v8, %v556_v58  ;;  %v592_v6 = vsel %vm1847_vm15, %v436_v21, 0.0 }
  0x6a   : > { %v593_v26 = vsel %vm1854_vm14, %v437_v53, 0.0  ;;  %v517_v55 = vsub.f32 %v513_v3, %v1842_v49  ;;  %v522_v16 = vcombine.low %v514_v0, %v515_v61  ;;  %v2176_v28 = vlaneseq }
  0x6b   : > { %v1942_v51 = vadd.f32 %v564_v33, %v560_v36  ;;  %v594_v44 = vsel %vm1815_vm12, %v438_v62, 0.0  ;;  %v595_v8 = vsel %vm1827_vm9, %v439_v43, 0.0  ;;  %v596_v40 = vsel %vm1847_vm15, %v440_v13, 0.0 }
  0x6c   : > { %vm1938_vm3 = vcmp.lt.s32.totalorder %v2176_v28, 512  ;;  %v597_v0 = vsel %vm1854_vm14, %v441_v14, 0.0  ;;  %v598_v49 = vadd.f32 %v591_v42, %v590_v41  ;;  %v523_v58 = vcombine.low %v516_v31, %v517_v55 }
  0x6d   : > { %v530_v21 = vrot.slane %v522_v16, %v1559_v29  ;;  %v599_v33 = vadd.f32 %v595_v8, %v594_v44  ;;  %v675_v53 = vadd.f32 %v674_v57, %v1869_v56  ;;  %v683_v62 = vadd.f32 %v682_v60, %v1877_v46 }
  0x6e   : > { %v600_v52 = vadd.f32 %v598_v49, %v592_v6  ;;  %v690_v63 = vrot.slane %v689_v48, 4  ;;  %v696_v17 = vsel %vm341_vm0, %v1927_v7, 0.0  ;;  %v537_v43 = vrot.slane %v523_v58, %v1559_v29 }
  0x6f   : > { %v601_v39 = vadd.f32 %v599_v33, %v596_v40  ;;  %v676_v13 = vrot.slane %v675_v53, 2  ;;  %v697_v14 = vadd.f32 %v1922_v34, %v696_v17  ;;  %v684_v19 = vrot.slane %v683_v62, 2 }
  0x70   : > { %v1962_v25 = vadd.f32 %v600_v52, %v593_v26  ;;  %v691_v59 = vadd.f32 %v690_v63, %v689_v48  ;;  %v2179_v56 = vrot.slane %v1831_v47, 4  ;;  %v538_v57 = vcombine.low %v530_v21, %v537_v43 }
  0x71   : > { %v1967_v60 = vadd.f32 %v601_v39, %v597_v0  ;;  %v677_v30 = vadd.f32 %v676_v13, %v675_v53  ;;  %v698_v36 = vrot.slane %v697_v14, 4  ;;  %v685_v15 = vadd.f32 %v684_v19, %v683_v62 }
  0x72   : > { %v751_v46 = vadd.f32 %v2179_v56, %v1831_v47  ;;  %v692_v41 = vrot.slane %v691_v59, 2  ;;  %v2180_v3 = vrot.slane %v1833_v12, 4  ;;  %v773_v42 = vadd.f32 %v1874_v27, %v1864_v37 }
  0x73   : > { %v545_v48 = vrot.slane %v538_v57, %v1559_v29  ;;  %v678_v31 = vrot.slane %v677_v30, 1  ;;  %v699_v6 = vadd.f32 %v698_v36, %v697_v14  ;;  %v2181_v47 = vrot.slane %v1835_v54, 4 }
  0x74   : > { %v759_v61 = vadd.f32 %v2180_v3, %v1833_v12  ;;  %v686_v55 = vrot.slane %v685_v15, 1  ;;  %v693_v16 = vadd.f32 %v692_v41, %v691_v59  ;;  %v752_v28 = vrot.slane %v751_v46, 2 }
  0x75   : > { %v767_v26 = vadd.f32 %v2181_v47, %v1835_v54  ;;  %vm2182_vm0 = vcmp.ne.s32.totalorder %v1504_v4, 4294967196  ;;  %v679_v40 = vadd.f32 %v678_v31, %v677_v30  ;;  %v700_v12 = vrot.slane %v699_v6, 2 }
  0x76   : > { %v760_v44 = vrot.slane %v759_v61, 2  ;;  %v547_v8 = vsel %vm2182_vm0, %v545_v48, 0.0  ;;  %v687_v37 = vadd.f32 %v686_v55, %v685_v15  ;;  %v694_v27 = vrot.slane %v693_v16, 1 }
  0x77   : > { %v768_v0 = vrot.slane %v767_v26, 2  ;;  %552 = vst.msk [vmem:[%s1980_s11] sm:$0xf] %vm1938_vm3, %v547_v8  ;;  %vm615_vm4 = vcmp.ne.s32.totalorder %v1567_v32, 4294967196  ;;  %v701_v54 = vadd.f32 %v700_v12, %v699_v6  ;;  %1273 = vrcp.f32 %v679_v40 }
  0x78   : > { %v774_v49 = vrot.slane %v773_v42, 4  ;;  %v695_v58 = vadd.f32 %v694_v27, %v693_v16  ;;  %1275 = vrcp.f32 %v687_v37  ;;  %v753_v4 = vadd.f32 %v752_v28, %v751_v46  ;;  %v2192_v28 = vld [vmem:[#allocation6_spill] sm:$0xff] }
  0x79   : > { %v761_v21 = vadd.f32 %v760_v44, %v759_v61  ;;  %v702_v33 = vrot.slane %v701_v54, 1  ;;  %v769_v53 = vadd.f32 %v768_v0, %v767_v26  ;;  %1277 = vlog2.f32 %v679_v40 }
  0x7a   : > { %v775_v52 = vadd.f32 %v774_v49, %v773_v42  ;;  %1279 = vrcp.f32 %v695_v58  ;;  %v2183_v17 = vmov 0   ;;  %v754_v39 = vrot.slane %v753_v4, 1 }
  0x7b   : > { %v703_v62 = vadd.f32 %v702_v33, %v701_v54  ;;  %1281 = vlog2.f32 %v687_v37  ;;  %v839_v43 = vsel %vm615_vm4, 1, %v2183_v17  ;;  %v762_v13 = vrot.slane %v761_v21, 1 }
  0x7c   : > { %v776_v63 = vrot.slane %v775_v52, 2  ;;  %1283 = vlog2.f32 %v695_v58  ;;  %v770_v14 = vrot.slane %v769_v53, 1  ;;  %v843_v19 = vrot.slane %v839_v43, %v1507_v5 }
  0x7d   : > { %1285 = vrcp.f32 %v703_v62  ;;  %v847_v59 = vrot.slane %v839_v43, %v1519_v9  ;;  %v851_v46 = vrot.slane %v839_v43, %v1522_v10  ;;  %v855_v57 = vrot.slane %v839_v43, %v1525_v11 }
  0x7e   : > { %1287 = vlog2.f32 %v703_v62  ;;  %v777_v56 = vadd.f32 %v776_v63, %v775_v52  ;;  %v755_v36 = vadd.f32 %v754_v39, %v753_v4  ;;  %v763_v15 = vadd.f32 %v762_v13, %v761_v21  ;;  %v2197_v13 = vld [vmem:[#allocation8_spill] sm:$0xff] }
  0x7f   : > { %v771_v41 = vadd.f32 %v770_v14, %v769_v53  ;;  %vm1995_vm5 = vcmp.eq.s32.totalorder %v843_v19, 1  ;;  %vm1999_vm6 = vcmp.eq.s32.totalorder %v847_v59, 1  ;;  %vm2005_vm7 = vcmp.eq.s32.totalorder %v851_v46, 1 }
  0x80   : > { %v778_v31 = vrot.slane %v777_v56, 1  ;;  %vm2015_vm8 = vcmp.eq.s32.totalorder %v855_v57, 1  ;;  %vm2193_vm9 = vcmp.eq.s32.totalorder %v1554_v24, %v2192_v28  ;;  %vm2198_vm12 = vcmp.eq.s32.totalorder %v1554_v24, %v2197_v13 }
  0x81   : > { %v1274_v30 = vpop.eup %1273 }
  0x82   : > { %v1276_v3 = vpop.eup %1275  ;;  %v708_v61 = vmul.f32 %v1274_v30, %v1753_v20  ;;  %v712_v42 = vmul.f32 %v1274_v30, %v1822_v18  ;;  %v779_v54 = vadd.f32 %v778_v31, %v777_v56 }
  0x83   : > { %v1278_v9 = vpop.eup %1277  ;;  %v709_v10 = vmul.f32 %v1276_v3, %v1798_v2  ;;  %v713_v11 = vmul.f32 %v1276_v3, %v1837_v45 }
  0x84   : > { %v1280_v20 = vpop.eup %1279  ;;  %v781_v18 = vmul.f32 0.6931472, %v1278_v9  ;;  %v823_v47 = vsel %vm732_vm10, %v708_v61, 0.0  ;;  %v827_v26 = vsel %vm736_vm13, %v712_v42, 0.0  ;;  %v860_v43 = vsel %vm1995_vm5, %v708_v61, 0.0 }
  0x85   : > { %v1282_v2 = vpop.eup %1281  ;;  %v710_v45 = vmul.f32 %v1280_v20, %v1810_v38  ;;  %v714_v16 = vmul.f32 %v1280_v20, %v1866_v22  ;;  %v824_v44 = vsel %vm733_vm11, %v709_v10, 0.0  ;;  %v828_v8 = vsel %vm2193_vm9, %v713_v11, 0.0  ;;  %v2194_v38 = vld [vmem:[#allocation7_spill] sm:$0xff] }
  0x86   : > { %v1284_v50 = vpop.eup %1283  ;;  %v783_v40 = vmul.f32 0.6931472, %v1282_v2  ;;  %v788_v12 = vsub.f32 %v781_v18, %v755_v36  ;;  %v831_v0 = vadd.f32 %v824_v44, %v823_v47  ;;  %v832_v37 = vadd.f32 %v828_v8, %v827_v26 }
  0x87   : > { %v1286_v27 = vpop.eup %1285  ;;  %v785_v49 = vmul.f32 0.6931472, %v1284_v50  ;;  %vm2195_vm10 = vcmp.eq.s32.totalorder %v1489_v1, %v2194_v38  ;;  %vm2196_vm11 = vcmp.eq.s32.totalorder %v1554_v24, %v2194_v38  ;;  %v864_v46 = vsel %vm1995_vm5, %v712_v42, 0.0 }
  0x88   : > { %v825_v22 = vsel %vm2195_vm10, %v710_v45, 0.0  ;;  %v829_v58 = vsel %vm2196_vm11, %v714_v16, 0.0  ;;  %v1288_v4 = vpop.eup %1287  ;;  %v711_v21 = vmul.f32 %v1286_v27, %v1922_v34  ;;  %v715_v33 = vmul.f32 %v1286_v27, %v1927_v7 }
  0x89   : > { %v789_v53 = vsub.f32 %v783_v40, %v763_v15  ;;  %v833_v52 = vadd.f32 %v831_v0, %v825_v22  ;;  %v787_v62 = vmul.f32 0.6931472, %v1288_v4  ;;  %v790_v63 = vsub.f32 %v785_v49, %v771_v41 }
  0x8a   : > { %v834_v17 = vadd.f32 %v832_v37, %v829_v58  ;;  %v826_v14 = vsel %vm735_vm1, %v711_v21, 0.0  ;;  %v830_v7 = vsel %vm2198_vm12, %v715_v33, 0.0  ;;  %v861_v34 = vsel %vm1999_vm6, %v709_v10, 0.0 }
  0x8b   : > { %v796_v39 = vcombine.low %v788_v12, %v789_v53  ;;  %v791_v19 = vsub.f32 %v787_v62, %v779_v54  ;;  %v835_v59 = vadd.f32 %v833_v52, %v826_v14  ;;  %v862_v24 = vsel %vm2005_vm7, %v710_v45, 0.0 }
  0x8c   : > { %v836_v56 = vadd.f32 %v834_v17, %v830_v7  ;;  %v865_v57 = vsel %vm1999_vm6, %v713_v11, 0.0  ;;  %v866_v30 = vsel %vm2005_vm7, %v714_v16, 0.0  ;;  %v868_v3 = vadd.f32 %v861_v34, %v860_v43 }
  0x8d   : > { %v804_v1 = vrot.slane %v796_v39, %v1559_v29  ;;  %v797_v36 = vcombine.low %v790_v63, %v791_v19  ;;  %v837_v15 = vadd.f32 %v835_v59, %v1930_v23  ;;  %v863_v61 = vsel %vm2015_vm8, %v711_v21, 0.0 }
  0x8e   : > { %v838_v41 = vadd.f32 %v836_v56, %v1942_v51  ;;  %v869_v42 = vadd.f32 %v865_v57, %v864_v46  ;;  %v867_v5 = vsel %vm2015_vm8, %v715_v33, 0.0  ;;  %v870_v9 = vadd.f32 %v868_v3, %v862_v24 }
  0x8f   : > { %v811_v48 = vrot.slane %v797_v36, %v1559_v29  ;;  %880 = vst [vmem:[%s318_s27] sm:$0xff] %v837_v15 }
  0x90   : > { %881 = vst [vmem:[%s318_s27 + $0x8] sm:$0x1] %v838_v41  ;;  %v871_v10 = vadd.f32 %v869_v42, %v866_v30  ;;  %v872_v11 = vadd.f32 %v870_v9, %v863_v61  ;;  %s1295_s27 = scalar_lea.vmem %s1294_s24, 256 }
  0x91   : > { %v812_v23 = vcombine.low %v804_v1, %v811_v48  ;;  %p1297_p5 = scmp.lt.s32.totalorder %s1295_s27, %s1289_s12 }
  0x92   : > { %v873_v51 = vadd.f32 %v871_v10, %v867_v5  ;;  %v874_v6 = vadd.f32 %v872_v11, %v1962_v25 }
  0x93   : > { %v819_v31 = vrot.slane %v812_v23, %v1559_v29  ;;  %p1298_p6 = por %p1297_p5, %p1296_p4 }
  0x94   : > { %v875_v20 = vadd.f32 %v873_v51, %v1967_v60  ;;  %882 = vst [vmem:[%s327_s8] sm:$0xff] %v874_v6 }
  0x95   : > { %v821_v18 = vsel %vm615_vm4, %v819_v31, 0.0  ;;  %p1299_p7 = pnand %p1298_p6, %p1292_p2 }
  0x96   : > { %822 = vst.msk [vmem:[%s1980_s11 + $0x4] sm:$0xf] %vm1938_vm3, %v821_v18  ;;  %883 = vst [vmem:[%s327_s8 + $0x8] sm:$0x1] %v875_v20 }
  0x97   : > { %1302 = shalt.err (!%p1299_p7)
}
  0x98   : > { %s1303_s26 = scalar_lea.hbm %s2081_s14, 128  ;;  %s1307_s19 = scalar_lea.hbm %s2143_s2, 512 }
  0x99   : > { %p1304_p9 = scmp.ne.s32.totalorder %s2081_s14, %s1303_s26  ;;  %p1308_p12 = scmp.lt.u32.totalorder %s2081_s14, %s2143_s2 }
  0x9a   : > { %p1309_p13 = scmp.lt.u32.totalorder %s1307_s19, %s1303_s26  ;;  %p1311_p1 = scmp.lt.u32.totalorder %s1303_s26, %s2081_s14 }
  0x9b   : > { %p1305_p10 = pnand %p1304_p9, %p1464_p3 }
  0x9c   : > { %p1310_p0 = por %p1309_p13, %p1308_p12 }
  0x9d   : > { %p1306_p11 = pneg %p1305_p10 }
  0x9e   : > { %p1312_p2 = por %p1311_p1, %p1310_p0 }
  0xa0   : > { %p1313_p4 = pnand %p1312_p2, %p1306_p11 }
  0xa2   : > { %1316 = shalt.err (!%p1313_p4)
}
  0xa3   : > { %1152 = dma.vmem_to_hbm [thread:$0]  (%p1464_p3), %s2083_s30, 128, %s2081_s14, %s901_s10  }
  0xa4 PF: > { %p1158_p5 = scmp.ge.s32.totalorder %s1383_s22, 2  ;;  %s955_s8 = sand.u32 1, %s1355_s15  }
  0xa5   : > { %s956_s9 = scalar_lea.sflag [#allocation3], %s955_s8 }
  0xa6   : > { %p1155_p6 = pnand %p1158_p5, %p1473_p8 }
  0xa8   : > { %1350 = dma.done.wait (!%p1155_p6), %s956_s9, 128  }
  0xa9   : > { %1352 = vsyncadd (!%p1155_p6), %s956_s9, 4294967168  ;;  %s18_s22 = sadd.s32 1, %s1383_s22   ;;  %s2199_s28 = sld [smem:[#allocation5_spill]] }
  0xaa   : > { %p15_p7 = scmp.ge.s32.totalorder %s18_s22, 6   ;;  %s2200_s15 = smov %s1359_s16 }
  0xab   : > { %s2201_s16 = smov %s1363_s17  ;;  %s2202_s17 = smov %s1482_s7 }
  0xac   : > { %s2203_s18 = smov %s1375_s20  ;;  %s2204_s19 = smov %s1379_s21 }
  0xad   : > { %s2205_s20 = smov %s2208_s25  ;;  %17 = sbr.rel (!%p15_p7) target bundleno = 5 (0x5), region = 98 }
  0xaf   : > { %s2206_s21 = smov %s2199_s28 }
  0xb4   :  { %985 = vsyncpa [#allocation3], 1 }
  0xb5   :  { %987 = vsyncpa [#allocation3 + $0x1], 1 }

</bundles_post_ra>
